<compile_context>
chip_gen: v7x
topology: tpu7x:2x2x1
jax: 0.10.0
libtpu: 0.0.40
codegen_flags: <defaults>
</compile_context>

<pallas_src>
import functools

import numpy as np
import jax
import jax.numpy as jnp
from jax import lax
from jax.experimental import pallas as pl
from jax.experimental.pallas import tpu as pltpu


# ----------------------------------------------------------------------------
# Elementwise helper: tanh-approx gelu (EUP tanh, ~4 VALU ops; f32 math)
# ----------------------------------------------------------------------------
def _gelu(x):
    c = 0.7978845608028654  # sqrt(2/pi)
    return 0.5 * x * (1.0 + jnp.tanh(c * (x + 0.044715 * x * x * x)))


# ----------------------------------------------------------------------------
# Kernel A (grid=(1,)): batch-invariant graph prologue
#   nf   = GraphConv^L(nf) with gelu                    (N, H)
#   q||k = nf @ [W_q | W_k] + [b_q | b_k]               (N, 2H)  [one matmul]
#   p    = softmax(scale * q k^T)  (unmasked)           (N, N)
# ----------------------------------------------------------------------------
def _graph_kernel(nf_ref, adj_ref, wgc_ref, brel_ref, wqk_ref, bqk_ref,
                  p_ref, *, num_layers, hidden, scale):
    n = nf_ref.shape[0]
    nf = nf_ref[...]                                        # (N, H) f32
    adj = adj_ref[...]                                      # (N, N) bf16 row-normalized
    wgc = wgc_ref[...]                                      # (H, 2H) bf16 = [W_root | W_rel]
    brel = jnp.broadcast_to(brel_ref[...], (n, hidden))     # hoisted out of the layer loop

    for _ in range(num_layers):                             # static unroll
        nfw = jnp.dot(nf.astype(jnp.bfloat16), wgc,
                      preferred_element_type=jnp.float32)   # (N, 2H)
        agg = jnp.dot(adj, nfw[:, hidden:].astype(jnp.bfloat16),
                      preferred_element_type=jnp.float32)   # adj @ (nf @ W_rel)
        nf = _gelu(nfw[:, :hidden] + agg + brel)

    qk = jnp.dot(nf.astype(jnp.bfloat16), wqk_ref[...],
                 preferred_element_type=jnp.float32) + bqk_ref[...]
    q = qk[:, :hidden].astype(jnp.bfloat16)
    k = qk[:, hidden:].astype(jnp.bfloat16)
    scores = lax.dot_general(q, k, (((1,), (1,)), ((), ())),
                             preferred_element_type=jnp.float32) * scale   # (N, N)

    mx = jnp.max(scores, axis=-1, keepdims=True)
    e = jnp.exp(scores - mx)
    p_ref[...] = e * pl.reciprocal(jnp.sum(e, axis=-1, keepdims=True), approx=True)


def _graph_call(nf0, prep, *, N, H):
    scale = 1.0 / float(np.sqrt(H))
    kernel = functools.partial(_graph_kernel, num_layers=prep["num_layers"],
                               hidden=H, scale=scale)
    return pl.pallas_call(
        kernel,
        out_shape=jax.ShapeDtypeStruct((N, N), jnp.float32),
        grid=(1,),
        in_specs=[
            pl.BlockSpec((N, H), lambda i: (0, 0)),        # nf (embedding)
            pl.BlockSpec((N, N), lambda i: (0, 0)),        # adj (bf16)
            pl.BlockSpec((H, 2 * H), lambda i: (0, 0)),    # [W_root | W_rel] (bf16)
            pl.BlockSpec((1, H), lambda i: (0, 0)),        # b_rel
            pl.BlockSpec((H, 2 * H), lambda i: (0, 0)),    # [W_q | W_k] (bf16)
            pl.BlockSpec((1, 2 * H), lambda i: (0, 0)),    # [b_q | b_k]
        ],
        out_specs=pl.BlockSpec((N, N), lambda i: (0, 0)),
        compiler_params=pltpu.CompilerParams(dimension_semantics=("arbitrary",)),
    )(nf0, prep["adj"], prep["w_gc"], prep["b_rel"], prep["w_qk"], prep["b_qk"])


# ----------------------------------------------------------------------------
# Kernel B (grid over B*N row blocks, "parallel"): in_lin + gelu + V projection
#   V = (gelu(xf @ W_in + b_in)) @ W_v + b_v            (B*N, H), emitted bf16
# ----------------------------------------------------------------------------
def _vproj_kernel(xf_ref, win_ref, bin_ref, wv_ref, bv_ref, v_ref):
    xh = _gelu(jnp.dot(xf_ref[...].astype(jnp.bfloat16), win_ref[...],
                       preferred_element_type=jnp.float32) + bin_ref[...])
    v_ref[...] = (jnp.dot(xh.astype(jnp.bfloat16), wv_ref[...],
                          preferred_element_type=jnp.float32)
                  + bv_ref[...]).astype(v_ref.dtype)


def _vproj_call(xf_flat, prep, *, BN, H, TH, row_block=512):
    RT = BN if BN <= row_block else row_block
    return pl.pallas_call(
        _vproj_kernel,
        out_shape=jax.ShapeDtypeStruct((BN, H), jnp.bfloat16),
        grid=(pl.cdiv(BN, RT),),
        in_specs=[
            pl.BlockSpec((RT, TH), lambda i: (i, 0)),      # xf row block (pipelined)
            pl.BlockSpec((TH, H), lambda i: (0, 0)),       # W_in (bf16)
            pl.BlockSpec((1, H), lambda i: (0, 0)),        # b_in
            pl.BlockSpec((H, H), lambda i: (0, 0)),        # W_v (bf16)
            pl.BlockSpec((1, H), lambda i: (0, 0)),        # b_v
        ],
        out_specs=pl.BlockSpec((RT, H), lambda i: (i, 0)),
        compiler_params=pltpu.CompilerParams(dimension_semantics=("parallel",)),
    )(xf_flat, prep["w_in"], prep["b_in"], prep["w_v"], prep["b_v"])


# ----------------------------------------------------------------------------
# Kernel C (grid over batch blocks, "parallel"): masked softmax + conf + rec + out_lin
#   num  = where(mask_key, 0, p) ; den = row-sum(num)   -> conf == den
#   attn = num / den ; rec = attn @ V ; out = rec @ W_out + b_out
# ----------------------------------------------------------------------------
def _attn_kernel(p_ref, v_ref, m_ref, wout_ref, bout_ref, out_ref, conf_ref):
    bt, n, h = v_ref.shape
    p = p_ref[...]                                   # (N, N) unmasked softmax, f32
    mb = m_ref[...] > 0.5                            # (Bt, 1, N); True => key masked

    num = jnp.where(mb, 0.0, p[None, :, :])          # (Bt, N, N)
    den = jnp.sum(num, axis=-1, keepdims=True)       # (Bt, N, 1)
    conf_ref[...] = den.reshape(bt * n, 1)           # conf_i = 1 - sum_j p[i,j] m_j = den_i

    safe = jnp.where(den > 0.0, den, 1.0)            # all-masked rows: num==0 -> attn==0
    attn = num * pl.reciprocal(safe, approx=True)

    rec = jnp.einsum("bij,bjd->bid", attn.astype(jnp.bfloat16), v_ref[...],
                     preferred_element_type=jnp.float32)           # (Bt, N, H)
    rec2 = rec.reshape(bt * n, h).astype(jnp.bfloat16)
    out_ref[...] = jnp.dot(rec2, wout_ref[...],
                           preferred_element_type=jnp.float32) + bout_ref[...]


def _attention_call(p_all, V3, s_mask, prep, *, B, N, H, TH, Bt):
    return pl.pallas_call(
        _attn_kernel,
        out_shape=(
            jax.ShapeDtypeStruct((B * N, TH), jnp.float32),   # rec @ W_out + b_out
            jax.ShapeDtypeStruct((B * N, 1), jnp.float32),    # conf (tiny; lane-sparse ok)
        ),
        grid=(B // Bt,),
        in_specs=[
            pl.BlockSpec((N, N), lambda b: (0, 0)),           # p_all (shared)
            pl.BlockSpec((Bt, N, H), lambda b: (b, 0, 0)),    # V, Bt batches per step (bf16)
            pl.BlockSpec((Bt, 1, N), lambda b: (b, 0, 0)),    # spatial key mask
            pl.BlockSpec((H, TH), lambda b: (0, 0)),          # W_out (bf16)
            pl.BlockSpec((1, TH), lambda b: (0, 0)),          # b_out
        ],
        out_specs=(
            pl.BlockSpec((Bt * N, TH), lambda b: (b, 0)),
            pl.BlockSpec((Bt * N, 1), lambda b: (b, 0)),
        ),
        compiler_params=pltpu.CompilerParams(dimension_semantics=("parallel",)),
    )(p_all, V3, s_mask, prep["w_out"], prep["b_out"])


# ----------------------------------------------------------------------------
# One-time parameter prep (fused weights, bf16 cast, biases as (1, D) rows)
# ----------------------------------------------------------------------------
def prepare_params(params, adj):
    bf = lambda w: w.astype(jnp.bfloat16)
    return dict(
        num_layers=params["num_layers"],
        emb=params["emb"],
        adj=bf(adj),
        w_in=bf(params["w_in"]), b_in=params["b_in"].reshape(1, -1),
        w_gc=bf(jnp.concatenate([params["w_root"], params["w_rel"]], axis=1)),
        b_rel=params["b_rel"].reshape(1, -1),
        w_qk=bf(jnp.concatenate([params["w_q"], params["w_k"]], axis=1)),
        b_qk=jnp.concatenate([params["b_q"], params["b_k"]]).reshape(1, -1),
        w_v=bf(params["w_v"]), b_v=params["b_v"].reshape(1, -1),
        w_out=bf(params["w_out"]), b_out=params["b_out"].reshape(1, -1),
    )


def build_adjacency(edge_index, num_nodes):
    # dense row-normalized adjacency for 'mean' aggregation (src -> dst);
    # static graph, built once outside the forward path.
    src, dst = edge_index[0], edge_index[1]
    adj = jnp.zeros((num_nodes, num_nodes), jnp.float32).at[dst, src].add(1.0)
    return adj / jnp.maximum(jnp.sum(adj, axis=1, keepdims=True), 1.0)


def _pick_batch_block(B, max_bt=8):
    for bt in range(min(B, max_bt), 0, -1):
        if B % bt == 0:
            return bt
    return 1


# ----------------------------------------------------------------------------
# Full forward: three Pallas calls + tiny JAX glue (gather / mask reduce / reshape)
# ----------------------------------------------------------------------------
def spatial_attention_forward(prep, node_embed, xf, mask):
    B, N, T, H = xf.shape
    TH = T * H

    xf_flat = xf.reshape(B * N, TH)
    nf0 = prep["emb"][node_embed]                                       # (N, H) glue gather
    s_mask = jnp.all(mask.reshape(B, N, -1), axis=-1).astype(jnp.float32).reshape(B, 1, N)

    p_all = _graph_call(nf0, prep, N=N, H=H)                            # (N, N)
    V = _vproj_call(xf_flat, prep, BN=B * N, H=H, TH=TH)                # (B*N, H) bf16
    Bt = _pick_batch_block(B)
    out, conf = _attention_call(p_all, V.reshape(B, N, H), s_mask, prep,
                                B=B, N=N, H=H, TH=TH, Bt=Bt)
    return out.reshape(B, N, T, H), conf.reshape(B, N)


# ----------------------------------------------------------------------------
# Pure-JAX reference (f32, exact erf gelu) for a sanity check
# ----------------------------------------------------------------------------
def reference_forward(params, node_embed, xf, adj, mask):
    B, N, T, H = xf.shape
    gelu = lambda x: 0.5 * x * (1.0 + lax.erf(x * 0.7071067811865476))
    xh = gelu(xf.reshape(B, N, T * H) @ params["w_in"] + params["b_in"])
    nf = params["emb"][node_embed]
    for _ in range(params["num_layers"]):
        nf = gelu((adj @ nf) @ params["w_rel"] + params["b_rel"] + nf @ params["w_root"])
    q = nf @ params["w_q"] + params["b_q"]
    k = nf @ params["w_k"] + params["b_k"]
    v = xh @ params["w_v"] + params["b_v"]
    scores = (q @ k.T) / np.sqrt(H).astype(np.float32)
    scores = jnp.broadcast_to(scores[None], (B, N, N))
    s_mask = jnp.all(mask.reshape(B, N, -1), axis=-1)                   # (B, N)
    sm = jnp.broadcast_to(s_mask[:, None, :], (B, N, N))
    p_all = jax.nn.softmax(scores, axis=-1)
    conf = 1.0 - jnp.sum(p_all * sm.astype(jnp.float32), axis=-1)
    A = jax.nn.softmax(jnp.where(sm, -jnp.inf, scores), axis=-1)
    A = jnp.nan_to_num(A, nan=0.0)
    rec = jnp.einsum("bij,bjd->bid", A, v)
    rec = rec @ params["w_out"] + params["b_out"]
    return rec.reshape(B, N, T, H), conf


# ----------------------------------------------------------------------------
# Deterministic parameter init
# ----------------------------------------------------------------------------
def init_params(key, num_nodes, in_len, hidden_dim, num_layers):
    ks = jax.random.split(key, 9)

    def lin(k, fan_in, fan_out):
        kw, kb = jax.random.split(k)
        lim = 1.0 / np.sqrt(fan_in)
        w = jax.random.uniform(kw, (fan_in, fan_out), jnp.float32, -lim, lim)
        b = jax.random.uniform(kb, (fan_out,), jnp.float32, -lim, lim)
        return w, b

    w_in, b_in = lin(ks[0], in_len * hidden_dim, hidden_dim)
    emb = jax.random.normal(ks[1], (num_nodes, hidden_dim), jnp.float32)
    w_rel, b_rel = lin(ks[2], hidden_dim, hidden_dim)
    w_root, _ = lin(ks[3], hidden_dim, hidden_dim)        # PyG lin_root has no bias
    w_q, b_q = lin(ks[4], hidden_dim, hidden_dim)
    w_k, b_k = lin(ks[5], hidden_dim, hidden_dim)
    w_v, b_v = lin(ks[6], hidden_dim, hidden_dim)
    w_out, b_out = lin(ks[7], hidden_dim, in_len * hidden_dim)
    return dict(
        num_layers=num_layers,
        w_in=w_in, b_in=b_in, emb=emb,
        w_rel=w_rel, b_rel=b_rel, w_root=w_root,
        w_q=w_q, b_q=b_q, w_k=w_k, b_k=b_k, w_v=w_v, b_v=b_v,
        w_out=w_out, b_out=b_out,
    )


if __name__ == "__main__":
    B, N, T, H = 2, 8, 4, 32
    num_nodes, num_layers = N, 2

    key = jax.random.PRNGKey(0)
    k_param, k_x, k_m = jax.random.split(key, 3)
    params = init_params(k_param, num_nodes, T, H, num_layers)

    xf = jax.random.normal(k_x, (B, N, T, H), jnp.float32)
    node_embed = jnp.arange(N, dtype=jnp.int32)

    # bidirectional ring graph
    ar = jnp.arange(N, dtype=jnp.int32)
    src = jnp.concatenate([ar, (ar + 1) % N])
    dst = jnp.concatenate([(ar + 1) % N, ar])
    edge_index = jnp.stack([src, dst]).astype(jnp.int32)   # (2, 16)
    adj = build_adjacency(edge_index, N)                   # hoisted: static graph
    prep = prepare_params(params, adj)                     # one-time fused/bf16 weight prep

    # boolean mask (True = missing); force a couple of fully-masked nodes
    mask = jax.random.bernoulli(k_m, 0.5, (B, N, T, 1))
    mask = mask.at[0, 0].set(True)
    mask = mask.at[1, 3].set(True)

    rec, conf = spatial_attention_forward(prep, node_embed, xf, mask)
    rec = jax.block_until_ready(rec)
    conf = jax.block_until_ready(conf)

    with jax.default_matmul_precision("highest"):
        rec_r, conf_r = reference_forward(params, node_embed, xf, adj, mask)

    np.testing.assert_allclose(np.asarray(rec), np.asarray(rec_r), rtol=2e-2, atol=2e-2)
    np.testing.assert_allclose(np.asarray(conf), np.asarray(conf_r), rtol=2e-2, atol=2e-2)
    assert rec.shape == (B, N, T, H) and conf.shape == (B, N)

    print("KERNEL_OK")
</pallas_src>

<mosaic_0001>
module attributes {stable_mosaic.version = 11 : i64} {
  func.func @_graph_kernel(%arg0: i32, %arg1: memref<8x32xf32, #tpu.memory_space<vmem>>, %arg2: memref<8x8xbf16, #tpu.memory_space<vmem>>, %arg3: memref<32x64xbf16, #tpu.memory_space<vmem>>, %arg4: memref<1x32xf32, #tpu.memory_space<vmem>>, %arg5: memref<32x64xbf16, #tpu.memory_space<vmem>>, %arg6: memref<1x64xf32, #tpu.memory_space<vmem>>, %arg7: memref<8x8xf32, #tpu.memory_space<vmem>>) attributes {dimension_semantics = [#tpu.dimension_semantics<arbitrary>], iteration_bounds = array<i64: 1>, scalar_prefetch = 0 : i64, scratch_operands = 0 : i64, tpu.core_type = #tpu.core_type<tc>, window_params = [{pipeline_mode = #tpu.pipeline_mode<synchronous>, transform_indices = @transform_0, window_bounds = array<i64: 8, 32>}, {pipeline_mode = #tpu.pipeline_mode<synchronous>, transform_indices = @transform_1, window_bounds = array<i64: 8, 8>}, {pipeline_mode = #tpu.pipeline_mode<synchronous>, transform_indices = @transform_2, window_bounds = array<i64: 32, 64>}, {pipeline_mode = #tpu.pipeline_mode<synchronous>, transform_indices = @transform_3, window_bounds = array<i64: 1, 32>}, {pipeline_mode = #tpu.pipeline_mode<synchronous>, transform_indices = @transform_4, window_bounds = array<i64: 32, 64>}, {pipeline_mode = #tpu.pipeline_mode<synchronous>, transform_indices = @transform_5, window_bounds = array<i64: 1, 64>}, {pipeline_mode = #tpu.pipeline_mode<synchronous>, transform_indices = @transform_6, window_bounds = array<i64: 8, 8>}]} {
    %c0 = arith.constant 0 : index
    %c0_0 = arith.constant 0 : index
    %0 = vector.load %arg1[%c0, %c0_0] : memref<8x32xf32, #tpu.memory_space<vmem>>, vector<8x32xf32>
    %c0_1 = arith.constant 0 : index
    %c0_2 = arith.constant 0 : index
    %1 = vector.load %arg2[%c0_1, %c0_2] : memref<8x8xbf16, #tpu.memory_space<vmem>>, vector<8x8xbf16>
    %c0_3 = arith.constant 0 : index
    %c0_4 = arith.constant 0 : index
    %2 = vector.load %arg3[%c0_3, %c0_4] : memref<32x64xbf16, #tpu.memory_space<vmem>>, vector<32x64xbf16>
    %c0_5 = arith.constant 0 : index
    %c0_6 = arith.constant 0 : index
    %3 = vector.load %arg4[%c0_5, %c0_6] : memref<1x32xf32, #tpu.memory_space<vmem>>, vector<1x32xf32>
    %4 = vector.shape_cast %3 : vector<1x32xf32> to vector<1x32xf32>
    %5 = vector.broadcast %4 : vector<1x32xf32> to vector<8x32xf32>
    %6 = arith.truncf %0 : vector<8x32xf32> to vector<8x32xbf16>
    %cst = arith.constant dense<0.000000e+00> : vector<8x64xf32>
    %7 = tpu.matmul %6, %2, %cst {dimension_numbers = #tpu.dot_dimension_numbers<[1], [0], [0], [1], [0, 0, 1, 1], [], []>} : vector<8x32xbf16>, vector<32x64xbf16>, vector<8x64xf32> -> vector<8x64xf32>
    %8 = vector.extract_strided_slice %7 {offsets = [0, 32], sizes = [8, 32], strides = [1, 1]} : vector<8x64xf32> to vector<8x32xf32>
    %9 = arith.truncf %8 : vector<8x32xf32> to vector<8x32xbf16>
    %cst_7 = arith.constant dense<0.000000e+00> : vector<8x32xf32>
    %10 = tpu.matmul %1, %9, %cst_7 {dimension_numbers = #tpu.dot_dimension_numbers<[1], [0], [0], [1], [0, 0, 1, 1], [], []>} : vector<8x8xbf16>, vector<8x32xbf16>, vector<8x32xf32> -> vector<8x32xf32>
    %11 = vector.extract_strided_slice %7 {offsets = [0, 0], sizes = [8, 32], strides = [1, 1]} : vector<8x64xf32> to vector<8x32xf32>
    %12 = arith.addf %11, %10 : vector<8x32xf32>
    %13 = arith.addf %12, %5 : vector<8x32xf32>
    %cst_8 = arith.constant 5.000000e-01 : f32
    %14 = vector.broadcast %cst_8 : f32 to vector<8x32xf32>
    %15 = arith.mulf %14, %13 : vector<8x32xf32>
    %cst_9 = arith.constant 4.471500e-02 : f32
    %16 = vector.broadcast %cst_9 : f32 to vector<8x32xf32>
    %17 = arith.mulf %16, %13 : vector<8x32xf32>
    %18 = arith.mulf %17, %13 : vector<8x32xf32>
    %19 = arith.mulf %18, %13 : vector<8x32xf32>
    %20 = arith.addf %13, %19 : vector<8x32xf32>
    %cst_10 = arith.constant 0.797884583 : f32
    %21 = vector.broadcast %cst_10 : f32 to vector<8x32xf32>
    %22 = arith.mulf %21, %20 : vector<8x32xf32>
    %23 = math.tanh %22 : vector<8x32xf32>
    %cst_11 = arith.constant 1.000000e+00 : f32
    %24 = vector.broadcast %cst_11 : f32 to vector<8x32xf32>
    %25 = arith.addf %24, %23 : vector<8x32xf32>
    %26 = arith.mulf %15, %25 : vector<8x32xf32>
    %27 = arith.truncf %26 : vector<8x32xf32> to vector<8x32xbf16>
    %cst_12 = arith.constant dense<0.000000e+00> : vector<8x64xf32>
    %28 = tpu.matmul %27, %2, %cst_12 {dimension_numbers = #tpu.dot_dimension_numbers<[1], [0], [0], [1], [0, 0, 1, 1], [], []>} : vector<8x32xbf16>, vector<32x64xbf16>, vector<8x64xf32> -> vector<8x64xf32>
    %29 = vector.extract_strided_slice %28 {offsets = [0, 32], sizes = [8, 32], strides = [1, 1]} : vector<8x64xf32> to vector<8x32xf32>
    %30 = arith.truncf %29 : vector<8x32xf32> to vector<8x32xbf16>
    %cst_13 = arith.constant dense<0.000000e+00> : vector<8x32xf32>
    %31 = tpu.matmul %1, %30, %cst_13 {dimension_numbers = #tpu.dot_dimension_numbers<[1], [0], [0], [1], [0, 0, 1, 1], [], []>} : vector<8x8xbf16>, vector<8x32xbf16>, vector<8x32xf32> -> vector<8x32xf32>
    %32 = vector.extract_strided_slice %28 {offsets = [0, 0], sizes = [8, 32], strides = [1, 1]} : vector<8x64xf32> to vector<8x32xf32>
    %33 = arith.addf %32, %31 : vector<8x32xf32>
    %34 = arith.addf %33, %5 : vector<8x32xf32>
    %cst_14 = arith.constant 5.000000e-01 : f32
    %35 = vector.broadcast %cst_14 : f32 to vector<8x32xf32>
    %36 = arith.mulf %35, %34 : vector<8x32xf32>
    %cst_15 = arith.constant 4.471500e-02 : f32
    %37 = vector.broadcast %cst_15 : f32 to vector<8x32xf32>
    %38 = arith.mulf %37, %34 : vector<8x32xf32>
    %39 = arith.mulf %38, %34 : vector<8x32xf32>
    %40 = arith.mulf %39, %34 : vector<8x32xf32>
    %41 = arith.addf %34, %40 : vector<8x32xf32>
    %cst_16 = arith.constant 0.797884583 : f32
    %42 = vector.broadcast %cst_16 : f32 to vector<8x32xf32>
    %43 = arith.mulf %42, %41 : vector<8x32xf32>
    %44 = math.tanh %43 : vector<8x32xf32>
    %cst_17 = arith.constant 1.000000e+00 : f32
    %45 = vector.broadcast %cst_17 : f32 to vector<8x32xf32>
    %46 = arith.addf %45, %44 : vector<8x32xf32>
    %47 = arith.mulf %36, %46 : vector<8x32xf32>
    %48 = arith.truncf %47 : vector<8x32xf32> to vector<8x32xbf16>
    %c0_18 = arith.constant 0 : index
    %c0_19 = arith.constant 0 : index
    %49 = vector.load %arg5[%c0_18, %c0_19] : memref<32x64xbf16, #tpu.memory_space<vmem>>, vector<32x64xbf16>
    %cst_20 = arith.constant dense<0.000000e+00> : vector<8x64xf32>
    %50 = tpu.matmul %48, %49, %cst_20 {dimension_numbers = #tpu.dot_dimension_numbers<[1], [0], [0], [1], [0, 0, 1, 1], [], []>} : vector<8x32xbf16>, vector<32x64xbf16>, vector<8x64xf32> -> vector<8x64xf32>
    %c0_21 = arith.constant 0 : index
    %c0_22 = arith.constant 0 : index
    %51 = vector.load %arg6[%c0_21, %c0_22] : memref<1x64xf32, #tpu.memory_space<vmem>>, vector<1x64xf32>
    %52 = vector.broadcast %51 : vector<1x64xf32> to vector<8x64xf32>
    %53 = arith.addf %50, %52 : vector<8x64xf32>
    %54 = vector.extract_strided_slice %53 {offsets = [0, 0], sizes = [8, 32], strides = [1, 1]} : vector<8x64xf32> to vector<8x32xf32>
    %55 = arith.truncf %54 : vector<8x32xf32> to vector<8x32xbf16>
    %56 = vector.extract_strided_slice %53 {offsets = [0, 32], sizes = [8, 32], strides = [1, 1]} : vector<8x64xf32> to vector<8x32xf32>
    %57 = arith.truncf %56 : vector<8x32xf32> to vector<8x32xbf16>
    %cst_23 = arith.constant dense<0.000000e+00> : vector<8x8xf32>
    %58 = tpu.matmul %55, %57, %cst_23 {dimension_numbers = #tpu.dot_dimension_numbers<[1], [1], [0], [0], [0, 0, 1, 0], [], []>} : vector<8x32xbf16>, vector<8x32xbf16>, vector<8x8xf32> -> vector<8x8xf32>
    %cst_24 = arith.constant 0.176776692 : f32
    %59 = vector.broadcast %cst_24 : f32 to vector<8x8xf32>
    %60 = arith.mulf %58, %59 : vector<8x8xf32>
    %cst_25 = arith.constant dense<0xFF800000> : vector<8xf32>
    %61 = vector.multi_reduction <maximumf>, %60, %cst_25 [1] : vector<8x8xf32> to vector<8xf32>
    %62 = vector.shape_cast %61 : vector<8xf32> to vector<8x1xf32>
    %63 = vector.broadcast %62 : vector<8x1xf32> to vector<8x8xf32>
    %64 = arith.subf %60, %63 : vector<8x8xf32>
    %65 = math.exp %64 : vector<8x8xf32>
    %cst_26 = arith.constant dense<0.000000e+00> : vector<8xf32>
    %66 = vector.multi_reduction <add>, %65, %cst_26 [1] : vector<8x8xf32> to vector<8xf32>
    %67 = vector.shape_cast %66 : vector<8xf32> to vector<8x1xf32>
    %68 = tpu.reciprocal %67 {approx = true} : vector<8x1xf32> -> vector<8x1xf32>
    %69 = vector.broadcast %68 : vector<8x1xf32> to vector<8x8xf32>
    %70 = arith.mulf %65, %69 : vector<8x8xf32>
    %c0_27 = arith.constant 0 : index
    %c0_28 = arith.constant 0 : index
    %71 = vector.load %arg7[%c0_27, %c0_28] : memref<8x8xf32, #tpu.memory_space<vmem>>, vector<8x8xf32>
    tpu.vector_store %arg7[%c0_27, %c0_28], %70 {strides = array<i32>} : memref<8x8xf32, #tpu.memory_space<vmem>>, vector<8x8xf32>,
    return
  }
  func.func @transform_0(%arg0: i32) -> (i32, i32) {
    %c0_i32 = arith.constant 0 : i32
    %c0_i32_0 = arith.constant 0 : i32
    %c0_i32_1 = arith.constant 0 : i32
    return %c0_i32, %c0_i32_0 : i32, i32
  }
  func.func @transform_1(%arg0: i32) -> (i32, i32) {
    %c0_i32 = arith.constant 0 : i32
    %c0_i32_0 = arith.constant 0 : i32
    %c0_i32_1 = arith.constant 0 : i32
    return %c0_i32, %c0_i32_0 : i32, i32
  }
  func.func @transform_2(%arg0: i32) -> (i32, i32) {
    %c0_i32 = arith.constant 0 : i32
    %c0_i32_0 = arith.constant 0 : i32
    %c0_i32_1 = arith.constant 0 : i32
    return %c0_i32, %c0_i32_0 : i32, i32
  }
  func.func @transform_3(%arg0: i32) -> (i32, i32) {
    %c0_i32 = arith.constant 0 : i32
    %c0_i32_0 = arith.constant 0 : i32
    %c0_i32_1 = arith.constant 0 : i32
    return %c0_i32, %c0_i32_0 : i32, i32
  }
  func.func @transform_4(%arg0: i32) -> (i32, i32) {
    %c0_i32 = arith.constant 0 : i32
    %c0_i32_0 = arith.constant 0 : i32
    %c0_i32_1 = arith.constant 0 : i32
    return %c0_i32, %c0_i32_0 : i32, i32
  }
  func.func @transform_5(%arg0: i32) -> (i32, i32) {
    %c0_i32 = arith.constant 0 : i32
    %c0_i32_0 = arith.constant 0 : i32
    %c0_i32_1 = arith.constant 0 : i32
    return %c0_i32, %c0_i32_0 : i32, i32
  }
  func.func @transform_6(%arg0: i32) -> (i32, i32) {
    %c0_i32 = arith.constant 0 : i32
    %c0_i32_0 = arith.constant 0 : i32
    %c0_i32_1 = arith.constant 0 : i32
    return %c0_i32, %c0_i32_0 : i32, i32
  }
}

</mosaic_0001>

<bundles_post_ra>
// kernel: tpu_custom_call.1
= control target key start
LH: loop header
LB: loop body
LE: loop exit
PB: predicated region body
PF: predicated region fallthrough
CT: control target
= control target key end

     0   :  { %11 = vsyncpa [#allocation3], 0  ;;  %s814_s0 = inlined_call_operand.hbm [shape: f32[8,32], index: 0, kind: input, shape index: {}]   ;;  %s815_s1 = inlined_call_operand.hbm [shape: bf16[8,8], index: 1, kind: input, shape index: {}]   ;;  %s816_s2 = inlined_call_operand.hbm [shape: bf16[32,64], index: 2, kind: input, shape index: {}]   ;;  %s817_s3 = inlined_call_operand.vmem [shape: f32[1,32], index: 3, kind: input, shape index: {}]   ;;  %s818_s4 = inlined_call_operand.hbm [shape: bf16[32,64], index: 4, kind: input, shape index: {}]   ;;  %s819_s5 = inlined_call_operand.vmem [shape: f32[1,64], index: 5, kind: input, shape index: {}]   ;;  %s820_s6 = inlined_call_operand.hbm [shape: f32[8,8], index: 6, kind: output, shape index: {}]  }
   0x1   :  { %12 = vsyncpa [#allocation6], 0 }
   0x2   :  { %13 = vsyncpa [#allocation9], 0 }
   0x3   :  { %14 = vsyncpa [#allocation4], 0  ;;  %s667_s21 = smov [#allocation5]   ;;  %s668_s23 = smov [#allocation2]  }
   0x4   :  { %s31_s22 = sshll.u32 %s667_s21, 4  ;;  %s21_s24 = sshll.u32 %s668_s23, 4  ;;  %s32_s22 = int_to_ptr.vmem [resolvable:$true] %s31_s22  ;;  %s22_s24 = int_to_ptr.vmem [resolvable:$true] %s21_s24 }
   0x5   :  { %s549_s27 = scalar_lea.hbm %s815_s1, 64 }
   0x6   :  { %p550_p0 = scmp.ne.s32.totalorder %s815_s1, %s549_s27  ;;  %p553_p1 = scmp.lt.u32.totalorder %s549_s27, %s815_s1 }
   0x8   :  { %p555_p2 = pnand %p553_p1, %p550_p0 }
   0xa   :  { %558 = shalt.err (!%p555_p2)
}
   0xb   :  { %s559_s8 = scalar_lea.vmem %s32_s22, 64  ;;  %p564_p4 = scmp.lt.s32.totalorder %s32_s22, %s32_s22 }
   0xc   :  { %p560_p3 = scmp.ne.s32.totalorder %s32_s22, %s559_s8  ;;  %p565_p5 = scmp.lt.s32.totalorder %s559_s8, %s559_s8 }
   0xe   :  { %p566_p6 = por %p565_p5, %p564_p4 }
  0x10   :  { %p567_p7 = pnand %p566_p6, %p560_p3 }
  0x12   :  { %570 = shalt.err (!%p567_p7)
}
  0x13   :  { %34 = dma.hbm_to_vmem [thread:$0]  %s815_s1, 64, %s32_s22, [#allocation6]  }
  0x14   :  { %s571_s13 = scalar_lea.hbm %s814_s0, 128 }
  0x15   :  { %p572_p8 = scmp.ne.s32.totalorder %s814_s0, %s571_s13  ;;  %p575_p9 = scmp.lt.u32.totalorder %s571_s13, %s814_s0 }
  0x17   :  { %p577_p10 = pnand %p575_p9, %p572_p8 }
  0x19   :  { %580 = shalt.err (!%p577_p10)
}
  0x1a   :  { %s581_s18 = scalar_lea.vmem %s22_s24, 128  ;;  %p586_p12 = scmp.lt.s32.totalorder %s22_s24, %s22_s24 }
  0x1b   :  { %p582_p11 = scmp.ne.s32.totalorder %s22_s24, %s581_s18  ;;  %p587_p13 = scmp.lt.s32.totalorder %s581_s18, %s581_s18 }
  0x1d   :  { %p588_p0 = por %p587_p13, %p586_p12 }
  0x1f   :  { %p589_p1 = pnand %p588_p0, %p582_p11 }
  0x21   :  { %592 = shalt.err (!%p589_p1)
}
  0x22   :  { %24 = dma.hbm_to_vmem [thread:$0]  %s814_s0, 128, %s22_s24, [#allocation3]  }
  0x23   :  { %s669_s20 = smov [#allocation7]   ;;  %s593_s25 = scalar_lea.hbm %s816_s2, 256 }
  0x24   :  { %s40_s21 = sshll.u32 %s669_s20, 4  ;;  %p594_p2 = scmp.ne.s32.totalorder %s816_s2, %s593_s25  ;;  %s41_s21 = int_to_ptr.vmem [resolvable:$true] %s40_s21 }
  0x25   :  { %p597_p3 = scmp.lt.u32.totalorder %s593_s25, %s816_s2 }
  0x27   :  { %p599_p4 = pnand %p597_p3, %p594_p2 }
  0x29   :  { %602 = shalt.err (!%p599_p4)
}
  0x2a   :  { %s603_s30 = scalar_lea.vmem %s41_s21, 256  ;;  %p608_p6 = scmp.lt.s32.totalorder %s41_s21, %s41_s21 }
  0x2b   :  { %p604_p5 = scmp.ne.s32.totalorder %s41_s21, %s603_s30  ;;  %p609_p7 = scmp.lt.s32.totalorder %s603_s30, %s603_s30 }
  0x2d   :  { %p610_p8 = por %p609_p7, %p608_p6 }
  0x2f   :  { %p611_p9 = pnand %p610_p8, %p604_p5 }
  0x31   :  { %614 = shalt.err (!%p611_p9)
}
  0x32   :  { %s670_s0 = smov 64   ;;  %s671_s24 = smov 4  }
  0x33   :  { %46 = dma.hbm_to_vmem [thread:$0]  %s816_s2, 256, %s41_s21, [#allocation6], %s670_s0, %s670_s0, %s671_s24  }
  0x34   :  { %s672_s9 = smov [#allocation8]   ;;  %s615_s13 = scalar_lea.hbm %s818_s4, 256 }
  0x35   :  { %s54_s10 = sshll.u32 %s672_s9, 4  ;;  %p616_p10 = scmp.ne.s32.totalorder %s818_s4, %s615_s13  ;;  %s55_s10 = int_to_ptr.vmem [resolvable:$true] %s54_s10 }
  0x36   :  { %p619_p11 = scmp.lt.u32.totalorder %s615_s13, %s818_s4 }
  0x38   :  { %p621_p12 = pnand %p619_p11, %p616_p10 }
  0x3a   :  { %624 = shalt.err (!%p621_p12)
}
  0x3b   :  { %s625_s18 = scalar_lea.vmem %s55_s10, 256  ;;  %p630_p0 = scmp.lt.s32.totalorder %s55_s10, %s55_s10 }
  0x3c   :  { %p626_p13 = scmp.ne.s32.totalorder %s55_s10, %s625_s18  ;;  %p631_p1 = scmp.lt.s32.totalorder %s625_s18, %s625_s18 }
  0x3e   :  { %p632_p2 = por %p631_p1, %p630_p0 }
  0x40   :  { %p633_p3 = pnand %p632_p2, %p626_p13 }
  0x42   :  { %636 = shalt.err (!%p633_p3)
}
  0x43   :  { %60 = dma.hbm_to_vmem [thread:$0]  %s818_s4, 256, %s55_s10, [#allocation9], %s670_s0, %s670_s0, %s671_s24  }
  0x44   :  { %659 = dma.done.wait [#allocation3], 128  }
  0x45   :  { %660 = vsyncadd [#allocation3], 4294967168 }
  0x46   :  { %661 = dma.done.wait [#allocation6], 320  }
  0x47   :  { %662 = vsyncadd [#allocation6], 4294966976 }
  0x48   :  { %663 = dma.done.wait [#allocation9], 256  }
  0x49   :  { %664 = vsyncadd [#allocation9], 4294967040  ;;  %v673_v0 = vmov 0.0   ;;  %vm674_vm0 = vmmov 0   ;;  %v537_v1 = vld [vmem:[#allocation7] sm:$0xff]   ;;  %v538_v2 = vld [vmem:[#allocation7 + $0x8] sm:$0xff]  }
  0x4a   :  { %485 = vmatprep.subr.bf16.mxu0 %v673_v0  ;;  %489 = vmatprep.mubr.msk.bf16.mxu0 %vm674_vm0, %v673_v0  ;;  %v76_v3 = vld [vmem:[#allocation2] sm:$0xff]  ;;  %vm102_vm1 = vcmask 261120   ;;  %s675_s4 = smov 96   ;;  %vm154_vm2 = vcmask 1043456   ;;  %v77_v12 = vld [vmem:[#allocation5] sm:$0xf] }
  0x4b   :  { %493 = vmatprep.subr.bf16.mxu1 %v673_v0  ;;  %495 = vmatprep.mubr.msk.bf16.mxu1 %vm674_vm0, %v673_v0  ;;  %v89_v4 = vpack.c.bf16 %v76_v3, %v76_v3  ;;  %vm150_vm3 = vcmask 64512   ;;  %v458_v13 = vld [vmem:[%s817_s3] ss:$0 sm:$0xff]  ;;  %v540_v38 = vld [vmem:[#allocation8 + $0x8] sm:$0xff]  }
  0x4c   :  { %486 = vmatpush3.bf16.msra.mxu0 %v537_v1  ;;  %v539_v37 = vld [vmem:[#allocation8] sm:$0xff]  }
  0x4d   :  { %487 = vmatprep.subr.bf16.mxu0 %v673_v0  ;;  %v465_v55 = vld [vmem:[%s819_s5] ss:$0 sm:$0xff]  ;;  %s676_s5 = smov [#allocation10]  }
  0x4e   :  { %s447_s22 = sshll.u32 %s676_s5, 4  ;;  %s448_s22 = int_to_ptr.vmem [resolvable:$true] %s447_s22 }
  0x4f   :  { %s637_s23 = scalar_lea.vmem %s448_s22, 128  ;;  %p642_p5 = scmp.lt.s32.totalorder %s448_s22, %s448_s22 }
  0x50   :  { %488 = vmatpush3.bf16.msra.mxu0 %v538_v2  ;;  %p638_p4 = scmp.ne.s32.totalorder %s448_s22, %s637_s23  ;;  %p643_p6 = scmp.lt.s32.totalorder %s637_s23, %s637_s23 }
  0x51   :  { %507 = vmatprep.subr.bf16.mxu0 %v673_v0 }
  0x52   :  { %p644_p7 = por %p643_p6, %p642_p5 }
  0x53   :  { %490 = vmatmul.mubr.msk.bf16.vlgmr.msra.gmra.mrb[0].mxu0 %vm102_vm1, %v89_v4 }
  0x54   :  { %509 = vmatprep.mubr.msk.bf16.mxu0 %vm674_vm0, %v673_v0  ;;  %p645_p8 = pnand %p644_p7, %p638_p4 }
 0x126   :  { %v140_v5 = vpop.f32.mrb[0].mxu0 }
 0x127   :  { %v491_v6 = vpop.f32.mrb[1].mxu0  ;;  %v146_v7 = vpack.c.bf16 %v140_v5, %v140_v5 }
 0x128   :  { %v143_v8 = vpop.f32.mrb[2].mxu0 }
 0x129   :  { %148 = vrot.lane.b32.xlu0 %v146_v7, %s675_s4  ;;  %v492_v9 = vpop.f32.mrb[3].mxu0 }
 0x19b   :  { %v149_v10 = vpop.permute.xlu0 %148 }
 0x19c   :  { %v156_v11 = vsel %vm154_vm2, %v149_v10, 0 }
 0x19d   :  { %494 = vmatpush3.bf16.msra.mxu1 %v156_v11 }
 0x19e   :  { %499 = vmatprep.subr.bf16.mxu1 %v673_v0 }
 0x1a0   :  { %496 = vmatmul.mubr.msk.bf16.vlgmr.msra.gmra.mrb[0].mxu1 %vm150_vm3, %v77_v12 }
 0x1a1   :  { %500 = vmatpush3.bf16.msra.mxu1 %v537_v1  ;;  %503 = vmatprep.mubr.msk.bf16.mxu1 %vm674_vm0, %v673_v0 }
 0x1a2   :  { %501 = vmatprep.subr.bf16.mxu1 %v673_v0 }
 0x1a5   :  { %502 = vmatpush3.bf16.msra.mxu1 %v538_v2 }
 0x1a6   :  { %513 = vmatprep.subr.bf16.mxu1 %v673_v0 }
 0x273   :  { %v192_v14 = vpop.f32.mrb[0].mxu1 }
 0x274   :  { %v198_v15 = vadd.f32 %v192_v14, %v140_v5  ;;  %v497_v16 = vpop.f32.mrb[1].mxu1 }
 0x275   :  { %v195_v17 = vpop.f32.mrb[2].mxu1 }
 0x276   :  { %v199_v18 = vadd.f32 %v458_v13, %v198_v15  ;;  %v498_v19 = vpop.f32.mrb[3].mxu1 }
 0x278   :  { %v201_v20 = vmul.f32 0.044715, %v199_v18  ;;  %v200_v26 = vmul.f32 0.5, %v199_v18 }
 0x27a   :  { %v202_v21 = vmul.f32 %v201_v20, %v199_v18 }
 0x27c   :  { %v203_v22 = vmul.f32 %v202_v21, %v199_v18 }
 0x27e   :  { %v204_v23 = vadd.f32 %v203_v22, %v199_v18 }
 0x280   :  { %v205_v24 = vmul.f32 0.7978846, %v204_v23 }
 0x282   :  { %541 = vtanh.f32 %v205_v24 }
 0x28c   :  { %v542_v25 = vpop.eup %541 }
 0x28d   :  { %v207_v27 = vadd.f32 1.0, %v542_v25 }
 0x28f   :  { %v208_v28 = vmul.f32 %v207_v27, %v200_v26 }
 0x291   :  { %v209_v29 = vpack.c.bf16 %v208_v28, %v208_v28 }
 0x293   :  { %504 = vmatmul.mubr.msk.bf16.vlgmr.msra.gmra.mrb[4].mxu1 %vm102_vm1, %v209_v29 }
 0x294   :  { %517 = vmatprep.mubr.msk.bf16.mxu1 %vm674_vm0, %v673_v0  ;;  %514 = vmatpush3.bf16.msra.mxu1 %v539_v37 }
 0x295   :  { %515 = vmatprep.subr.bf16.mxu1 %v673_v0 }
 0x298   :  { %516 = vmatpush3.bf16.msra.mxu1 %v540_v38 }
 0x366   :  { %v247_v30 = vpop.f32.mrb[4].mxu1 }
 0x367   :  { %v253_v31 = vpack.c.bf16 %v247_v30, %v247_v30  ;;  %v505_v32 = vpop.f32.mrb[5].mxu1 }
 0x368   :  { %v250_v33 = vpop.f32.mrb[6].mxu1 }
 0x369   :  { %255 = vrot.lane.b32.xlu0 %v253_v31, %s675_s4  ;;  %v506_v34 = vpop.f32.mrb[7].mxu1 }
 0x3db   :  { %v256_v35 = vpop.permute.xlu0 %255 }
 0x3dc   :  { %v258_v36 = vsel %vm154_vm2, %v256_v35, 0 }
 0x3dd   :  { %508 = vmatpush3.bf16.msra.mxu0 %v258_v36 }
 0x3de   :  { %521 = vmatprep.subr.bf16.mxu0 %v673_v0 }
 0x3e0   :  { %510 = vmatmul.mubr.msk.bf16.vlgmr.msra.gmra.mrb[4].mxu0 %vm150_vm3, %v77_v12 }
 0x3e1   :  { %523 = vmatprep.mubr.msk.bf16.mxu0 %vm674_vm0, %v673_v0 }
 0x4b3   :  { %v294_v39 = vpop.f32.mrb[4].mxu0 }
 0x4b4   :  { %v300_v40 = vadd.f32 %v294_v39, %v247_v30  ;;  %v511_v41 = vpop.f32.mrb[5].mxu0 }
 0x4b5   :  { %v297_v42 = vpop.f32.mrb[6].mxu0 }
 0x4b6   :  { %v301_v43 = vadd.f32 %v458_v13, %v300_v40  ;;  %v512_v44 = vpop.f32.mrb[7].mxu0 }
 0x4b8   :  { %v303_v45 = vmul.f32 0.044715, %v301_v43  ;;  %v302_v51 = vmul.f32 0.5, %v301_v43 }
 0x4ba   :  { %v304_v46 = vmul.f32 %v303_v45, %v301_v43 }
 0x4bc   :  { %v305_v47 = vmul.f32 %v304_v46, %v301_v43 }
 0x4be   :  { %v306_v48 = vadd.f32 %v305_v47, %v301_v43 }
 0x4c0   :  { %v307_v49 = vmul.f32 0.7978846, %v306_v48 }
 0x4c2   :  { %543 = vtanh.f32 %v307_v49 }
 0x4cc   :  { %v544_v50 = vpop.eup %543 }
 0x4cd   :  { %v309_v52 = vadd.f32 1.0, %v544_v50 }
 0x4cf   :  { %v310_v53 = vmul.f32 %v309_v52, %v302_v51 }
 0x4d1   :  { %v311_v54 = vpack.c.bf16 %v310_v53, %v310_v53 }
 0x4d3   :  { %518 = vmatmul.mubr.msk.bf16.vlgmr.msra.gmra.mrb[8].mxu1 %vm102_vm1, %v311_v54 }
 0x5a6   :  { %v372_v56 = vpop.f32.mrb[8].mxu1 }
 0x5a7   :  { %v373_v57 = vadd.f32 %v465_v55, %v372_v56  ;;  %v519_v58 = vpop.f32.mrb[9].mxu1 }
 0x5a8   :  { %v375_v59 = vpop.f32.mrb[10].mxu1 }
 0x5a9   :  { %v378_v60 = vpack.c.bf16 %v373_v57, %v373_v57  ;;  %v520_v61 = vpop.f32.mrb[11].mxu1 }
 0x5ab   :  { %380 = vrot.lane.b32.xlu1 %v378_v60, %s675_s4 }
 0x61d   :  { %v381_v62 = vpop.permute.xlu1 %380 }
 0x61e   :  { %v386_v63 = vsel %vm102_vm1, %v381_v62, 0 }
 0x61f   :  { %522 = vmatpush3.bf16.xpose.msra.mxu0 %v386_v63 }
 0x626   :  { %524 = vmatmul.mubr.msk.bf16.vlgmr.msra.gmra.mrb[8].mxu0 %vm102_vm1, %v378_v60 }
 0x6f9   :  { %v422_v0 = vpop.f32.mrb[8].mxu0 }
 0x6fa   :  { %v428_v1 = vmul.f32 0.17677669, %v422_v0  ;;  %v525_v2 = vpop.f32.mrb[9].mxu0 }
 0x6fb   :  { %v425_v3 = vpop.f32.mrb[10].mxu0 }
 0x6fc   :  { %v526_v4 = vpop.f32.mrb[11].mxu0  ;;  %v429_v5 = vsel %vm150_vm3, %v428_v1, -inf }
 0x6fd   :  { %430 = vmax.xlane.f32.xlu1 %v429_v5 }
 0x78a   :  { %v431_v6 = vpop.xlane.xlu1 %430 }
 0x78b   :  { %v432_v7 = vsub.f32 %v428_v1, %v431_v6 }
 0x78d   :  { %v433_v8 = vmul.f32 1.442695, %v432_v7 }
 0x78f   :  { %545 = vpow2.f32 %v433_v8 }
 0x799   :  { %v546_v9 = vpop.eup %545 }
 0x79a   :  { %v435_v10 = vsel %vm150_vm3, %v546_v9, 0.0 }
 0x79b   :  { %436 = vadd.xlane.f32.xlu0 %v435_v10 }
 0x828   :  { %v437_v11 = vpop.xlane.xlu0 %436 }
 0x829   :  { %547 = vrcp.f32 %v437_v11 }
 0x833   :  { %v548_v12 = vpop.eup %547 }
 0x834   :  { %v439_v13 = vmul.f32 %v548_v12, %v546_v9 }
 0x836   :  { %440 = vst.msk [vmem:[#allocation10] sm:$0xff] %vm150_vm3, %v439_v13 }
 0x837   :  { %648 = shalt.err (!%p645_p8)
}
 0x838   :  { %s649_s27 = scalar_lea.hbm %s820_s6, 128 }
 0x839   :  { %p650_p9 = scmp.ne.s32.totalorder %s820_s6, %s649_s27  ;;  %p653_p10 = scmp.lt.u32.totalorder %s649_s27, %s820_s6 }
 0x83b   :  { %p655_p11 = pnand %p653_p10, %p650_p9 }
 0x83d   :  { %658 = shalt.err (!%p655_p11)
}
 0x83e   :  { %450 = dma.vmem_to_hbm [thread:$0]  %s448_s22, 128, %s820_s6, [#allocation4]  }
 0x83f   :  { %665 = dma.done.wait [#allocation4], 128  }
 0x840   :  { %666 = vsyncadd [#allocation4], 4294967168 }
 0x841   :  { %454 = vsyncpa [#allocation3], 1 }
 0x842   :  { %455 = vsyncpa [#allocation6], 1 }
 0x843   :  { %456 = vsyncpa [#allocation9], 1 }
 0x844   :  { %457 = vsyncpa [#allocation4], 1 }

</bundles_post_ra>
